<compile_context>
chip_gen: v6e
topology: v6e:2x2x1
jax: 0.10.0
libtpu: 0.0.40
codegen_flags: <defaults>
</compile_context>

<pallas_src>
import functools

import jax
import jax.numpy as jnp
from jax import lax
from jax.experimental import pallas as pl
from jax.experimental.pallas import tpu as pltpu


def _round_up(n, m):
    return ((n + m - 1) // m) * m


def _discriminator_kernel(x_ref, w1_ref, pw_ref, b2_ref, o_ref, *, mxu_bf16):
    # x_ref : (TB, H)  input tile (contiguous DMA slab of the (B, H) array)
    # w1_ref: (H, H)   fc1.weight (torch layout: out x in), VMEM-resident
    #                  (already bf16 if mxu_bf16 — cast once in the wrapper)
    # pw_ref: (H, 2)   column 0 = fc1.bias, column 1 = fc2.weight, VMEM-resident
    # b2_ref: (1,)     fc2.bias scalar in SMEM
    # o_ref : (1, TB)  lane-dense output tile (batch on lanes)
    x = x_ref[...]
    w1 = w1_ref[...]
    if mxu_bf16 and x.dtype != jnp.bfloat16:
        # MXU takes bf16 inputs with f32 accumulation on v5e/v6e/v7x. Casting
        # here saves no HBM bytes; pass x as bf16 from the caller for that.
        x = x.astype(jnp.bfloat16)

    # fc1 in transposed orientation: h^T[o, b] = sum_i W1[o, i] * x[b, i] -> (H, TB)
    h = lax.dot_general(
        w1, x,
        dimension_numbers=(((1,), (1,)), ((), ())),
        preferred_element_type=jnp.float32,
    )
    h = h + pw_ref[:, 0:1]          # fc1.bias broadcast over lanes (f32, VPU)
    h = jnp.maximum(h, 0.0)         # ReLU (f32)

    # TODO(synk): nn.Dropout(p=0.25) is training-only; eval-mode forward is
    # identity. A training path would need pltpu.prng_seed + prng_random_bits.

    # fc2 (out width 1): VPU multiply + XLU sublane reduction -> (1, TB).
    y = jnp.sum(h * pw_ref[:, 1:2], axis=0, keepdims=True) + b2_ref[0]

    # sigmoid = 1 / (1 + exp(-y)); exp and approximate reciprocal run on the EUP.
    o_ref[...] = pl.reciprocal(1.0 + jnp.exp(-y), approx=True).astype(o_ref.dtype)


def discriminator_forward(x, W1, b1, W2, b2, *, block_b=1024, mxu_bf16=True,
                          core_parallel=False, x_buffers=None):
    """Forward pass of `discriminator`.

    x : (B, H) float32 or bfloat16
    W1: (H, H)  = fc1.weight (torch layout: out x in)
    b1: (H,)    = fc1.bias
    W2: (1, H)  = fc2.weight
    b2: (1,)    = fc2.bias
    Returns (B, 1) in x.dtype.
    """
    B, H = x.shape

    # Clamp the tile to the 128-rounded batch so small/ragged batches don't DMA
    # and compute on padded lanes; keep it a multiple of 128 for unmasked stores.
    block_b = max(128, min(_round_up(block_b, 128), _round_up(B, 128)))
    num_tiles = pl.cdiv(B, block_b)
    Bp = num_tiles * block_b

    if mxu_bf16:
        W1 = W1.astype(jnp.bfloat16)   # cast once; 8 KiB at H=64, VMEM-resident

    # Pack fc1.bias and fc2.weight into a single (H, 2) VMEM-resident input.
    packed = jnp.concatenate(
        [b1.reshape(H, 1).astype(jnp.float32),
         W2.reshape(H, 1).astype(jnp.float32)], axis=1)
    b2_s = b2.reshape(1).astype(jnp.float32)

    kernel = functools.partial(_discriminator_kernel, mxu_bf16=mxu_bf16)

    x_spec_kwargs = {}
    if x_buffers is not None:
        x_spec_kwargs["pipeline_mode"] = pl.Buffered(x_buffers)

    dims = (pltpu.CORE_PARALLEL,) if core_parallel else (pltpu.PARALLEL,)

    out = pl.pallas_call(
        kernel,
        out_shape=jax.ShapeDtypeStruct((1, Bp), x.dtype),
        grid=(num_tiles,),
        in_specs=[
            pl.BlockSpec((block_b, H), lambda i: (i, 0), **x_spec_kwargs),  # x tile
            pl.BlockSpec((H, H), lambda i: (0, 0)),        # W1, VMEM-resident
            pl.BlockSpec((H, 2), lambda i: (0, 0)),        # [b1 | w2] columns
            pl.BlockSpec(memory_space=pltpu.MemorySpace.SMEM),  # b2 scalar
        ],
        out_specs=pl.BlockSpec((1, block_b), lambda i: (0, i)),
        compiler_params=pltpu.CompilerParams(dimension_semantics=dims),
    )(x, W1, packed, b2_s)

    # Padded lanes of a partial last tile contain garbage; they are discarded here.
    return out[0, :B].reshape(B, 1)


def _reference_forward(x, W1, b1, W2, b2):
    h = jnp.maximum(x @ W1.T + b1, 0.0)
    return jax.nn.sigmoid(h @ W2.T + b2)


if __name__ == "__main__":
    hidden = 64     # module default hidden_1=64
    batch = 512

    key = jax.random.PRNGKey(0)
    kx, kw1, kb1, kw2, kb2 = jax.random.split(key, 5)

    # PyTorch-like uniform(-1/sqrt(fan_in), 1/sqrt(fan_in)) init, torch weight layouts.
    bound = 1.0 / jnp.sqrt(hidden)
    W1 = jax.random.uniform(kw1, (hidden, hidden), jnp.float32, -bound, bound)  # fc1.weight
    b1 = jax.random.uniform(kb1, (hidden,), jnp.float32, -bound, bound)         # fc1.bias
    W2 = jax.random.uniform(kw2, (1, hidden), jnp.float32, -bound, bound)       # fc2.weight
    b2 = jax.random.uniform(kb2, (1,), jnp.float32, -bound, bound)              # fc2.bias

    x = jax.random.normal(kx, (batch, hidden), jnp.float32)
    ref = _reference_forward(x, W1, b1, W2, b2)

    # Default path: bf16 MXU inputs (all TPU generations), f32 accumulate/elementwise.
    out = jax.block_until_ready(discriminator_forward(x, W1, b1, W2, b2))
    assert out.shape == (batch, 1), out.shape
    assert jnp.allclose(out, ref, atol=2e-2, rtol=2e-2)

    # Full-f32 MXU path (tightest match; only the EUP approx reciprocal differs).
    out_f32 = jax.block_until_ready(
        discriminator_forward(x, W1, b1, W2, b2, mxu_bf16=False))
    assert jnp.allclose(out_f32, ref, atol=1e-2, rtol=1e-2)

    # bf16 activations from the caller: halves the dominant x HBM transfer.
    out_bf16x = jax.block_until_ready(
        discriminator_forward(x.astype(jnp.bfloat16), W1, b1, W2, b2))
    assert jnp.allclose(out_bf16x.astype(jnp.float32), ref, atol=3e-2, rtol=3e-2)

    # Ragged batch exercises tile clamping + the partial-edge-block path (no jnp.pad).
    out_ragged = jax.block_until_ready(
        discriminator_forward(x[:300], W1, b1, W2, b2))
    assert out_ragged.shape == (300, 1)
    assert jnp.allclose(out_ragged, ref[:300], atol=2e-2, rtol=2e-2)

    print("KERNEL_OK")
</pallas_src>

<mosaic_0001>
module attributes {stable_mosaic.version = 11 : i64} {
  func.func @_discriminator_kernel(%arg0: i32, %arg1: memref<512x64xf32, #tpu.memory_space<vmem>>, %arg2: memref<64x64xbf16, #tpu.memory_space<vmem>>, %arg3: memref<64x2xf32, #tpu.memory_space<vmem>>, %arg4: memref<1xf32, #tpu.memory_space<smem>>, %arg5: memref<1x512xf32, #tpu.memory_space<vmem>>) attributes {dimension_semantics = [#tpu.dimension_semantics<parallel>], iteration_bounds = array<i64: 1>, scalar_prefetch = 0 : i64, scratch_operands = 0 : i64, tpu.core_type = #tpu.core_type<tc>, window_params = [{transform_indices = @transform_0, window_bounds = array<i64: 512, 64>}, {pipeline_mode = #tpu.pipeline_mode<synchronous>, transform_indices = @transform_1, window_bounds = array<i64: 64, 64>}, {pipeline_mode = #tpu.pipeline_mode<synchronous>, transform_indices = @transform_2, window_bounds = array<i64: 64, 2>}, {transform_indices = @transform_3, window_bounds = array<i64: 1>}, {transform_indices = @transform_4, window_bounds = array<i64: 1, 512>}]} {
    %c0 = arith.constant 0 : index
    %c0_0 = arith.constant 0 : index
    %0 = vector.load %arg1[%c0, %c0_0] : memref<512x64xf32, #tpu.memory_space<vmem>>, vector<512x64xf32>
    %c0_1 = arith.constant 0 : index
    %c0_2 = arith.constant 0 : index
    %1 = vector.load %arg2[%c0_1, %c0_2] : memref<64x64xbf16, #tpu.memory_space<vmem>>, vector<64x64xbf16>
    %2 = arith.truncf %0 : vector<512x64xf32> to vector<512x64xbf16>
    %cst = arith.constant dense<0.000000e+00> : vector<64x512xf32>
    %3 = tpu.matmul %1, %2, %cst {dimension_numbers = #tpu.dot_dimension_numbers<[1], [1], [0], [0], [0, 0, 1, 0], [], []>} : vector<64x64xbf16>, vector<512x64xbf16>, vector<64x512xf32> -> vector<64x512xf32>
    %c0_3 = arith.constant 0 : index
    %c0_4 = arith.constant 0 : index
    %4 = vector.load %arg3[%c0_3, %c0_4] : memref<64x2xf32, #tpu.memory_space<vmem>>, vector<64x1xf32>
    %5 = vector.broadcast %4 : vector<64x1xf32> to vector<64x512xf32>
    %6 = arith.addf %3, %5 : vector<64x512xf32>
    %cst_5 = arith.constant 0.000000e+00 : f32
    %7 = vector.broadcast %cst_5 : f32 to vector<64x512xf32>
    %8 = arith.maximumf %6, %7 : vector<64x512xf32>
    %c0_6 = arith.constant 0 : index
    %c1 = arith.constant 1 : index
    %9 = vector.load %arg3[%c0_6, %c1] : memref<64x2xf32, #tpu.memory_space<vmem>>, vector<64x1xf32>
    %10 = vector.broadcast %9 : vector<64x1xf32> to vector<64x512xf32>
    %11 = arith.mulf %8, %10 : vector<64x512xf32>
    %cst_7 = arith.constant dense<0.000000e+00> : vector<512xf32>
    %12 = vector.multi_reduction <add>, %11, %cst_7 [0] : vector<64x512xf32> to vector<512xf32>
    %13 = vector.shape_cast %12 : vector<512xf32> to vector<1x512xf32>
    %c0_8 = arith.constant 0 : index
    %14 = memref.load %arg4[%c0_8] : memref<1xf32, #tpu.memory_space<smem>>
    %15 = vector.broadcast %14 : f32 to vector<1x512xf32>
    %16 = arith.addf %13, %15 : vector<1x512xf32>
    %cst_9 = arith.constant 0.000000e+00 : f32
    %17 = vector.broadcast %cst_9 : f32 to vector<1x512xf32>
    %18 = arith.subf %17, %16 : vector<1x512xf32>
    %19 = math.exp %18 : vector<1x512xf32>
    %cst_10 = arith.constant 1.000000e+00 : f32
    %20 = vector.broadcast %cst_10 : f32 to vector<1x512xf32>
    %21 = arith.addf %20, %19 : vector<1x512xf32>
    %22 = tpu.reciprocal %21 {approx = true} : vector<1x512xf32> -> vector<1x512xf32>
    %c0_11 = arith.constant 0 : index
    %c0_12 = arith.constant 0 : index
    %23 = vector.load %arg5[%c0_11, %c0_12] : memref<1x512xf32, #tpu.memory_space<vmem>>, vector<1x512xf32>
    tpu.vector_store %arg5[%c0_11, %c0_12], %22 {strides = array<i32>} : memref<1x512xf32, #tpu.memory_space<vmem>>, vector<1x512xf32>,
    return
  }
  func.func @transform_0(%arg0: i32) -> (i32, i32) {
    %c0_i32 = arith.constant 0 : i32
    %c0_i32_0 = arith.constant 0 : i32
    return %arg0, %c0_i32 : i32, i32
  }
  func.func @transform_1(%arg0: i32) -> (i32, i32) {
    %c0_i32 = arith.constant 0 : i32
    %c0_i32_0 = arith.constant 0 : i32
    %c0_i32_1 = arith.constant 0 : i32
    return %c0_i32, %c0_i32_0 : i32, i32
  }
  func.func @transform_2(%arg0: i32) -> (i32, i32) {
    %c0_i32 = arith.constant 0 : i32
    %c0_i32_0 = arith.constant 0 : i32
    %c0_i32_1 = arith.constant 0 : i32
    return %c0_i32, %c0_i32_0 : i32, i32
  }
  func.func @transform_3(%arg0: i32) -> i32 {
    %c0_i32 = arith.constant 0 : i32
    %c0_i32_0 = arith.constant 0 : i32
    return %c0_i32 : i32
  }
  func.func @transform_4(%arg0: i32) -> (i32, i32) {
    %c0_i32 = arith.constant 0 : i32
    %c0_i32_0 = arith.constant 0 : i32
    return %c0_i32, %arg0 : i32, i32
  }
}

</mosaic_0001>

<bundles_post_ra>
// kernel: tpu_custom_call.1
= control target key start
LH: loop header
LB: loop body
LE: loop exit
PB: predicated region body
PF: predicated region fallthrough
CT: control target
= control target key end

     0   :  { %vm192_vm0 = vcmask 523264   ;;  %v797_v7 = vmov 0   ;;  %s1144_s0 = inlined_call_operand.vmem [shape: f32[512,64], index: 0, kind: input, shape index: {}]   ;;  %s1145_s1 = inlined_call_operand.vmem [shape: bf16[64,64], index: 1, kind: input, shape index: {}]   ;;  %s1146_s2 = inlined_call_operand.vmem [shape: f32[64,2], index: 2, kind: input, shape index: {}]   ;;  %s1147_s3 = inlined_call_operand.<no memory space> [shape: f32[1], index: 3, kind: input, shape index: {}]   ;;  %s1148_s4 = inlined_call_operand.hbm [shape: f32[1,512], index: 4, kind: output, shape index: {}]  }
   0x1   :  { %v50_v0 = vld [vmem:[%s1144_s0 + $0xf0] sm:$0xff]  ;;  %v51_v1 = vld [vmem:[%s1144_s0 + $0xf8] sm:$0xff]  ;;  %749 = vset.pattern.permute.xlu0 %v797_v7  ;;  %750 = vset.pattern.permute.xlu1 %v797_v7  ;;  %v48_v12 = vld [vmem:[%s1144_s0 + $0xe0] sm:$0xff] }
   0x2   :  { %v82_v2 = vld [vmem:[%s1144_s0 + $0x1f0] sm:$0xff]  ;;  %v107_v3 = vpack.c.bf16 %v51_v1, %v50_v0  ;;  %v83_v4 = vld [vmem:[%s1144_s0 + $0x1f8] sm:$0xff]  ;;  %v49_v14 = vld [vmem:[%s1144_s0 + $0xe8] sm:$0xff] }
   0x3   :  { %v34_v5 = vld [vmem:[%s1144_s0 + $0x70] sm:$0xff]  ;;  %v35_v6 = vld [vmem:[%s1144_s0 + $0x78] sm:$0xff]  ;;  %v123_v8 = vpack.c.bf16 %v83_v4, %v82_v2  ;;  %v80_v15 = vld [vmem:[%s1144_s0 + $0x1e0] sm:$0xff]  ;;  %v106_v18 = vpack.c.bf16 %v49_v14, %v48_v12 }
   0x4   :  { %v99_v9 = vpack.c.bf16 %v35_v6, %v34_v5  ;;  %v66_v10 = vld [vmem:[%s1144_s0 + $0x170] sm:$0xff]  ;;  %v67_v11 = vld [vmem:[%s1144_s0 + $0x178] sm:$0xff]  ;;  %729 = vmatprep.subr.msk.bf16.mxu0 %vm192_vm0, %v107_v3  ;;  %v81_v16 = vld [vmem:[%s1144_s0 + $0x1e8] sm:$0xff] }
   0x5   :  { %v115_v13 = vpack.c.bf16 %v67_v11, %v66_v10  ;;  %737 = vmatprep.subr.msk.bf16.mxu1 %vm192_vm0, %v123_v8  ;;  %v122_v19 = vpack.c.bf16 %v81_v16, %v80_v15  ;;  %v32_v20 = vld [vmem:[%s1144_s0 + $0x60] sm:$0xff]  ;;  %v33_v21 = vld [vmem:[%s1144_s0 + $0x68] sm:$0xff]  ;;  %v46_v27 = vld [vmem:[%s1144_s0 + $0xd0] sm:$0xff] }
   0x6   :  { %v227_v17 = vsel %vm192_vm0, %v99_v9, 0  ;;  %v64_v22 = vld [vmem:[%s1144_s0 + $0x160] sm:$0xff]  ;;  %v65_v24 = vld [vmem:[%s1144_s0 + $0x168] sm:$0xff]  ;;  %v98_v25 = vpack.c.bf16 %v33_v21, %v32_v20  ;;  %v47_v28 = vld [vmem:[%s1144_s0 + $0xd8] sm:$0xff] }
   0x7   :  { %682 = vmatpush3.bf16.xpose.msra.mxu0 %v227_v17  ;;  %v275_v23 = vsel %vm192_vm0, %v115_v13, 0  ;;  %v114_v26 = vpack.c.bf16 %v65_v24, %v64_v22  ;;  %v78_v29 = vld [vmem:[%s1144_s0 + $0x1d0] sm:$0xff]  ;;  %v79_v30 = vld [vmem:[%s1144_s0 + $0x1d8] sm:$0xff]  ;;  %v105_v32 = vpack.c.bf16 %v47_v28, %v46_v27  ;;  %v44_v41 = vld [vmem:[%s1144_s0 + $0xc0] sm:$0xff] }
   0x8   :  { %706 = vmatpush3.bf16.xpose.msra.mxu1 %v275_v23  ;;  %730 = vmatprep.subr.msk.bf16.mxu0 %vm192_vm0, %v106_v18  ;;  %v224_v31 = vsel %vm192_vm0, %v98_v25, 0  ;;  %v121_v34 = vpack.c.bf16 %v79_v30, %v78_v29  ;;  %v30_v35 = vld [vmem:[%s1144_s0 + $0x50] sm:$0xff]  ;;  %v31_v36 = vld [vmem:[%s1144_s0 + $0x58] sm:$0xff]  ;;  %v45_v42 = vld [vmem:[%s1144_s0 + $0xc8] sm:$0xff] }
   0x9   :  { %738 = vmatprep.subr.msk.bf16.mxu1 %vm192_vm0, %v122_v19  ;;  %v272_v33 = vsel %vm192_vm0, %v114_v26, 0  ;;  %v62_v37 = vld [vmem:[%s1144_s0 + $0x150] sm:$0xff]  ;;  %v63_v38 = vld [vmem:[%s1144_s0 + $0x158] sm:$0xff]  ;;  %v97_v39 = vpack.c.bf16 %v31_v36, %v30_v35  ;;  %v76_v43 = vld [vmem:[%s1144_s0 + $0x1c0] sm:$0xff]  ;;  %v104_v46 = vpack.c.bf16 %v45_v42, %v44_v41 }
   0xa   :  { %v113_v40 = vpack.c.bf16 %v63_v38, %v62_v37  ;;  %v77_v44 = vld [vmem:[%s1144_s0 + $0x1c8] sm:$0xff]  ;;  %v28_v49 = vld [vmem:[%s1144_s0 + $0x40] sm:$0xff]  ;;  %v42_v53 = vld [vmem:[%s1144_s0 + $0xb0] sm:$0xff] }
   0xb   :  { %v221_v45 = vsel %vm192_vm0, %v97_v39, 0  ;;  %v120_v48 = vpack.c.bf16 %v77_v44, %v76_v43  ;;  %v29_v50 = vld [vmem:[%s1144_s0 + $0x48] sm:$0xff]  ;;  %v60_v51 = vld [vmem:[%s1144_s0 + $0x140] sm:$0xff]  ;;  %v43_v54 = vld [vmem:[%s1144_s0 + $0xb8] sm:$0xff] }
   0xc   :  { %v269_v47 = vsel %vm192_vm0, %v113_v40, 0  ;;  %v61_v52 = vld [vmem:[%s1144_s0 + $0x148] sm:$0xff]  ;;  %v96_v55 = vpack.c.bf16 %v29_v50, %v28_v49  ;;  %v946_v56 = vld [vmem:[%s1145_s1] sm:$0xff]   ;;  %v74_v58 = vld [vmem:[%s1144_s0 + $0x1b0] sm:$0xff]  ;;  %v103_v63 = vpack.c.bf16 %v43_v54, %v42_v53 }
   0xd   :  { %v112_v57 = vpack.c.bf16 %v61_v52, %v60_v51  ;;  %v75_v59 = vld [vmem:[%s1144_s0 + $0x1b8] sm:$0xff]  ;;  %697 = vmatprep.mubr.msk.bf16.mxu0 %vm192_vm0, %v946_v56  ;;  %721 = vmatprep.mubr.msk.bf16.mxu1 %vm192_vm0, %v946_v56  ;;  %v124_v60 = vld [vmem:[%s1146_s2] sm:$0xff]  ;;  %v126_v61 = vld [vmem:[%s1146_s2 + $0x10] sm:$0xff] }
   0xe   :  { %v218_v62 = vsel %vm192_vm0, %v96_v55, 0  ;;  %134 = vperm.xlu0 %749, %v124_v60   ;;  %144 = vperm.xlu1 %750, %v126_v61   ;;  %v119_v1 = vpack.c.bf16 %v75_v59, %v74_v58  ;;  %v26_v2 = vld [vmem:[%s1144_s0 + $0x30] sm:$0xff]  ;;  %v27_v3 = vld [vmem:[%s1144_s0 + $0x38] sm:$0xff]  ;;  %v125_v6 = vld [vmem:[%s1146_s2 + $0x8] sm:$0xff] }
   0xf   :  { %684 = vmatpush3.bf16.xpose.msra.mxu0 %v224_v31  ;;  %v266_v0 = vsel %vm192_vm0, %v112_v57, 0  ;;  %v58_v4 = vld [vmem:[%s1144_s0 + $0x130] sm:$0xff]  ;;  %v59_v5 = vld [vmem:[%s1144_s0 + $0x138] sm:$0xff] }
  0x10   :  { %708 = vmatpush3.bf16.xpose.msra.mxu1 %v272_v33  ;;  %731 = vmatprep.subr.msk.bf16.mxu0 %vm192_vm0, %v105_v32 }
  0x11   :  { %739 = vmatprep.subr.msk.bf16.mxu1 %vm192_vm0, %v121_v34 }
  0x17   :  { %686 = vmatpush3.bf16.xpose.msra.mxu0 %v221_v45 }
  0x18   :  { %710 = vmatpush3.bf16.xpose.msra.mxu1 %v269_v47  ;;  %732 = vmatprep.subr.msk.bf16.mxu0 %vm192_vm0, %v104_v46 }
  0x19   :  { %740 = vmatprep.subr.msk.bf16.mxu1 %vm192_vm0, %v120_v48 }
  0x1a   :  { %10 = vsyncpa [#allocation4], 0  ;;  %v127_v8 = vld [vmem:[%s1146_s2 + $0x18] sm:$0xff]  ;;  %v95_v9 = vpack.c.bf16 %v27_v3, %v26_v2  ;;  %v111_v10 = vpack.c.bf16 %v59_v5, %v58_v4  ;;  %v40_v11 = vld [vmem:[%s1144_s0 + $0xa0] sm:$0xff]  ;;  %139 = vperm.xlu0 %749, %v125_v6   ;;  %v798_v21 = vmov 1  }
  0x1b   :  { %v41_v12 = vld [vmem:[%s1144_s0 + $0xa8] sm:$0xff]  ;;  %v72_v13 = vld [vmem:[%s1144_s0 + $0x1a0] sm:$0xff]  ;;  %149 = vperm.xlu1 %750, %v127_v8   ;;  %v38_v26 = vld [vmem:[%s1144_s0 + $0x90] sm:$0xff] }
  0x1c   :  { %v73_v14 = vld [vmem:[%s1144_s0 + $0x1a8] sm:$0xff]  ;;  %v215_v15 = vsel %vm192_vm0, %v95_v9, 0  ;;  %v102_v16 = vpack.c.bf16 %v41_v12, %v40_v11  ;;  %v263_v17 = vsel %vm192_vm0, %v111_v10, 0  ;;  %v24_v19 = vld [vmem:[%s1144_s0 + $0x20] sm:$0xff]  ;;  %v39_v27 = vld [vmem:[%s1144_s0 + $0x98] sm:$0xff] }
  0x1d   :  { %v118_v18 = vpack.c.bf16 %v73_v14, %v72_v13  ;;  %v25_v20 = vld [vmem:[%s1144_s0 + $0x28] sm:$0xff]  ;;  %v56_v22 = vld [vmem:[%s1144_s0 + $0x120] sm:$0xff]  ;;  %v70_v29 = vld [vmem:[%s1144_s0 + $0x190] sm:$0xff]  ;;  %v101_v32 = vpack.c.bf16 %v39_v27, %v38_v26 }
  0x1e   :  { %751 = vset.pattern.permute.xlu0 %v798_v21  ;;  %v57_v23 = vld [vmem:[%s1144_s0 + $0x128] sm:$0xff]  ;;  %v94_v24 = vpack.c.bf16 %v25_v20, %v24_v19  ;;  %v128_v28 = vld [vmem:[%s1146_s2 + $0x20] sm:$0xff]  ;;  %v71_v30 = vld [vmem:[%s1144_s0 + $0x198] sm:$0xff] }
  0x1f   :  { %688 = vmatpush3.bf16.xpose.msra.mxu0 %v218_v62  ;;  %480 = vperm.xlu0 %751, %v124_v60   ;;  %v110_v25 = vpack.c.bf16 %v57_v23, %v56_v22  ;;  %v117_v34 = vpack.c.bf16 %v71_v30, %v70_v29  ;;  %v22_v35 = vld [vmem:[%s1144_s0 + $0x10] sm:$0xff]  ;;  %v23_v36 = vld [vmem:[%s1144_s0 + $0x18] sm:$0xff]  ;;  %v129_v38 = vld [vmem:[%s1146_s2 + $0x28] sm:$0xff] }
  0x20   :  { %712 = vmatpush3.bf16.xpose.msra.mxu1 %v266_v0  ;;  %733 = vmatprep.subr.msk.bf16.mxu0 %vm192_vm0, %v103_v63  ;;  %v212_v31 = vsel %vm192_vm0, %v94_v24, 0  ;;  %v54_v37 = vld [vmem:[%s1144_s0 + $0x110] sm:$0xff]  ;;  %v93_v39 = vpack.c.bf16 %v23_v36, %v22_v35  ;;  %v36_v41 = vld [vmem:[%s1144_s0 + $0x80] sm:$0xff]  ;;  %v37_v42 = vld [vmem:[%s1144_s0 + $0x88] sm:$0xff] }
  0x21   :  { %741 = vmatprep.subr.msk.bf16.mxu1 %vm192_vm0, %v119_v1  ;;  %752 = vset.pattern.permute.xlu1 %v798_v21  ;;  %v260_v33 = vsel %vm192_vm0, %v110_v25, 0  ;;  %v68_v43 = vld [vmem:[%s1144_s0 + $0x180] sm:$0xff]  ;;  %v69_v44 = vld [vmem:[%s1144_s0 + $0x188] sm:$0xff]  ;;  %v130_v45 = vld [vmem:[%s1146_s2 + $0x30] sm:$0xff]  ;;  %v100_v47 = vpack.c.bf16 %v37_v42, %v36_v41 }
  0x22   :  { %484 = vperm.xlu1 %752, %v125_v6   ;;  %v209_v46 = vsel %vm192_vm0, %v93_v39, 0  ;;  %v116_v49 = vpack.c.bf16 %v69_v44, %v68_v43  ;;  %v20_v50 = vld [vmem:[%s1144_s0] sm:$0xff]  ;;  %v21_v51 = vld [vmem:[%s1144_s0 + $0x8] sm:$0xff]  ;;  %v131_v54 = vld [vmem:[%s1146_s2 + $0x38] sm:$0xff] }
  0x23   :  { %488 = vperm.xlu0 %751, %v126_v61   ;;  %v52_v52 = vld [vmem:[%s1144_s0 + $0x100] sm:$0xff]  ;;  %v53_v53 = vld [vmem:[%s1144_s0 + $0x108] sm:$0xff]  ;;  %v92_v55 = vpack.c.bf16 %v21_v51, %v20_v50  ;;  %v757_v61 = vld [vmem:[%s1145_s1 + $0x10] sm:$0xff]  }
  0x24   :  { %v108_v57 = vpack.c.bf16 %v53_v53, %v52_v52  ;;  %v756_v60 = vld [vmem:[%s1145_s1 + $0x8] sm:$0xff]  }
  0x25   :  { %v206_v58 = vsel %vm192_vm0, %v92_v55, 0 }
  0x26   :  { %753 = vset.pattern.permute.xlu1 %v797_v7  ;;  %v55_v7 = vld [vmem:[%s1144_s0 + $0x118] sm:$0xff]  ;;  %v254_v59 = vsel %vm192_vm0, %v108_v57, 0 }
  0x27   :  { %690 = vmatpush3.bf16.xpose.msra.mxu0 %v215_v15  ;;  %154 = vperm.xlu1 %753, %v128_v28   ;;  %v109_v40 = vpack.c.bf16 %v55_v7, %v54_v37 }
  0x28   :  { %714 = vmatpush3.bf16.xpose.msra.mxu1 %v263_v17  ;;  %734 = vmatprep.subr.msk.bf16.mxu0 %vm192_vm0, %v102_v16 }
  0x29   :  { %742 = vmatprep.subr.msk.bf16.mxu1 %vm192_vm0, %v118_v18  ;;  %492 = vperm.xlu0 %751, %v127_v8   ;;  %v257_v48 = vsel %vm192_vm0, %v109_v40, 0 }
  0x2b   :  { %159 = vperm.xlu1 %753, %v129_v38  }
  0x2d   :  { %496 = vperm.xlu0 %751, %v128_v28  }
  0x2f   :  { %692 = vmatpush3.bf16.xpose.msra.mxu0 %v212_v31  ;;  %164 = vperm.xlu1 %753, %v130_v45  }
  0x30   :  { %716 = vmatpush3.bf16.xpose.msra.mxu1 %v260_v33  ;;  %735 = vmatprep.subr.msk.bf16.mxu0 %vm192_vm0, %v101_v32 }
  0x31   :  { %743 = vmatprep.subr.msk.bf16.mxu1 %vm192_vm0, %v117_v34  ;;  %500 = vperm.xlu0 %751, %v129_v38  }
  0x33   :  { %169 = vperm.xlu1 %753, %v131_v54  }
  0x35   :  { %508 = vperm.xlu0 %751, %v131_v54  }
  0x37   :  { %694 = vmatpush3.bf16.xpose.msra.mxu0 %v209_v46  ;;  %754 = vset.pattern.permute.xlu1 %v798_v21 }
  0x38   :  { %718 = vmatpush3.bf16.xpose.msra.mxu1 %v257_v48  ;;  %736 = vmatprep.subr.msk.bf16.mxu0 %vm192_vm0, %v100_v47 }
  0x39   :  { %744 = vmatprep.subr.msk.bf16.mxu1 %vm192_vm0, %v116_v49  ;;  %504 = vperm.xlu1 %754, %v130_v45  }
  0x3f   :  { %696 = vmatpush3.bf16.xpose.msra.mxu0 %v206_v58 }
  0x40   :  { %720 = vmatpush3.bf16.xpose.msra.mxu1 %v254_v59 }
  0x46   :  { %698 = vmatmul.mubr.msk.bf16.vlgmr.msra.gmra.mxu0 %vm192_vm0, %v946_v56 }
  0x47   :  { %722 = vmatmul.mubr.msk.bf16.vlgmr.msra.gmra.mxu1 %vm192_vm0, %v946_v56  ;;  %699 = vmatprep.mubr.msk.bf16.mxu0 %vm192_vm0, %v756_v60  ;;  %v758_v56 = vld [vmem:[%s1145_s1 + $0x18] sm:$0xff]  }
  0x48   :  { %723 = vmatprep.mubr.msk.bf16.mxu1 %vm192_vm0, %v756_v60 }
  0x4e   :  { %700 = vmatmul.mubr.msk.bf16.gmra.mxu0 %vm192_vm0, %v756_v60 }
  0x4f   :  { %724 = vmatmul.mubr.msk.bf16.gmra.mxu1 %vm192_vm0, %v756_v60  ;;  %701 = vmatprep.mubr.msk.bf16.mxu0 %vm192_vm0, %v757_v61 }
  0x50   :  { %725 = vmatprep.mubr.msk.bf16.mxu1 %vm192_vm0, %v757_v61 }
  0x56   :  { %702 = vmatmul.mubr.msk.bf16.gmra.mxu0 %vm192_vm0, %v757_v61 }
  0x57   :  { %726 = vmatmul.mubr.msk.bf16.gmra.mxu1 %vm192_vm0, %v757_v61  ;;  %703 = vmatprep.mubr.msk.bf16.mxu0 %vm192_vm0, %v758_v56 }
  0x58   :  { %727 = vmatprep.mubr.msk.bf16.mxu1 %vm192_vm0, %v758_v56 }
  0x5e   :  { %704 = vmatmul.mubr.msk.bf16.gmra.mxu0 %vm192_vm0, %v758_v56 }
  0x5f   :  { %728 = vmatmul.mubr.msk.bf16.gmra.mxu1 %vm192_vm0, %v758_v56 }
  0x89   :  { %v145_v62 = vpop.permute.xlu1 %144  ;;  %v135_v63 = vpop.permute.xlu0 %134 }
  0x95   :  { %v140_v1 = vpop.permute.xlu0 %139 }
  0x96   :  { %v1114_v0 = vpop.permute.xlu1 %149 }
  0x9a   :  { %v481_v4 = vpop.permute.xlu0 %480 }
  0x9d   :  { %v485_v2 = vpop.permute.xlu1 %484 }
  0x9e   :  { %v489_v21 = vpop.permute.xlu0 %488 }
  0xa2   :  { %v1116_v13 = vpop.permute.xlu1 %154 }
  0xa4   :  { %v493_v48 = vpop.permute.xlu0 %492 }
  0xa6   :  { %v1118_v36 = vpop.permute.xlu1 %159 }
 0x106   :  { %v335_v3 = vpop.f32.mrf.mxu0 }
 0x107   :  { %v408_v5 = vpop.f32.mrf.mxu1  ;;  %v336_v6 = vadd.f32 %v335_v3, %v135_v63 }
 0x108   :  { %v409_v8 = vadd.f32 %v408_v5, %v135_v63  ;;  %v337_v9 = vpop.f32.mrf.mxu0 }
 0x109   :  { %v338_v10 = vadd.f32 %v337_v9, %v135_v63  ;;  %v410_v11 = vpop.f32.mrf.mxu1  ;;  %v447_v17 = vmax.f32 %v336_v6, 0.0 }
 0x10a   :  { %v411_v12 = vadd.f32 %v410_v11, %v135_v63  ;;  %v339_v14 = vpop.f32.mrf.mxu0  ;;  %v449_v18 = vmax.f32 %v409_v8, 0.0 }
 0x10b   :  { %v340_v15 = vadd.f32 %v339_v14, %v140_v1  ;;  %v412_v16 = vpop.f32.mrf.mxu1  ;;  %v448_v22 = vmax.f32 %v338_v10, 0.0  ;;  %v511_v33 = vmul.f32 %v481_v4, %v447_v17 }
 0x10c   :  { %v413_v19 = vadd.f32 %v412_v16, %v140_v1  ;;  %v341_v20 = vpop.f32.mrf.mxu0  ;;  %v450_v26 = vmax.f32 %v411_v12, 0.0  ;;  %v513_v34 = vmul.f32 %v481_v4, %v449_v18 }
 0x10d   :  { %v451_v23 = vmax.f32 %v340_v15, 0.0  ;;  %v342_v24 = vadd.f32 %v341_v20, %v140_v1  ;;  %v414_v25 = vpop.f32.mrf.mxu1  ;;  %v512_v38 = vmul.f32 %v481_v4, %v448_v22 }
 0x10e   :  { %v453_v27 = vmax.f32 %v413_v19, 0.0  ;;  %v415_v28 = vadd.f32 %v414_v25, %v140_v1  ;;  %v345_v29 = vpop.f32.mrf.mxu0  ;;  %v514_v43 = vmul.f32 %v481_v4, %v450_v26  ;;  %v1123_v4 = vpop.permute.xlu1 %164 }
 0x10f   :  { %v452_v30 = vmax.f32 %v342_v24, 0.0  ;;  %v346_v31 = vadd.f32 %v345_v29, %v145_v62  ;;  %v418_v32 = vpop.f32.mrf.mxu1  ;;  %v515_v39 = vmul.f32 %v485_v2, %v451_v23  ;;  %v497_v19 = vpop.permute.xlu0 %496 }
 0x110   :  { %v454_v35 = vmax.f32 %v415_v28, 0.0  ;;  %v419_v37 = vadd.f32 %v418_v32, %v145_v62  ;;  %v347_v7 = vpop.f32.mrf.mxu0  ;;  %v517_v44 = vmul.f32 %v485_v2, %v453_v27 }
 0x111   :  { %v455_v40 = vmax.f32 %v346_v31, 0.0  ;;  %v348_v41 = vadd.f32 %v347_v7, %v145_v62  ;;  %v420_v42 = vpop.f32.mrf.mxu1  ;;  %v516_v49 = vmul.f32 %v485_v2, %v452_v30  ;;  %v543_v60 = vadd.f32 %v515_v39, %v511_v33 }
 0x112   :  { %v457_v45 = vmax.f32 %v419_v37, 0.0  ;;  %v421_v46 = vadd.f32 %v420_v42, %v145_v62  ;;  %v349_v47 = vpop.f32.mrf.mxu0  ;;  %v518_v50 = vmul.f32 %v485_v2, %v454_v35  ;;  %v569_v1 = vadd.f32 %v517_v44, %v513_v34  ;;  %v170_v34 = vpop.permute.xlu1 %169 }
 0x113   :  { %v456_v51 = vmax.f32 %v348_v41, 0.0  ;;  %v350_v52 = vadd.f32 %v349_v47, %v1114_v0  ;;  %v422_v53 = vpop.f32.mrf.mxu1  ;;  %v519_v54 = vmul.f32 %v489_v21, %v455_v40  ;;  %v556_v8 = vadd.f32 %v516_v49, %v512_v38  ;;  %v501_v49 = vpop.permute.xlu0 %500 }
 0x114   :  { %v521_v55 = vmul.f32 %v489_v21, %v457_v45  ;;  %v458_v57 = vmax.f32 %v421_v46, 0.0  ;;  %v423_v58 = vadd.f32 %v422_v53, %v1114_v0  ;;  %v351_v59 = vpop.f32.mrf.mxu0  ;;  %v582_v9 = vadd.f32 %v518_v50, %v514_v43 }
 0x115   :  { %v520_v61 = vmul.f32 %v489_v21, %v456_v51  ;;  %v459_v56 = vmax.f32 %v350_v52, 0.0  ;;  %v352_v63 = vadd.f32 %v351_v59, %v1114_v0  ;;  %v424_v62 = vpop.f32.mrf.mxu1  ;;  %v544_v14 = vadd.f32 %v543_v60, %v519_v54 }
 0x116   :  { %v522_v3 = vmul.f32 %v489_v21, %v458_v57  ;;  %v461_v2 = vmax.f32 %v423_v58, 0.0  ;;  %v425_v5 = vadd.f32 %v424_v62, %v1114_v0  ;;  %v355_v6 = vpop.f32.mrf.mxu0  ;;  %v570_v15 = vadd.f32 %v569_v1, %v521_v55 }
 0x117   :  { %v460_v10 = vmax.f32 %v352_v63, 0.0  ;;  %v356_v11 = vadd.f32 %v355_v6, %v1116_v13  ;;  %v428_v12 = vpop.f32.mrf.mxu1  ;;  %v557_v20 = vadd.f32 %v556_v8, %v520_v61  ;;  %v523_v21 = vmul.f32 %v493_v48, %v459_v56  ;;  %v505_v61 = vpop.permute.xlu1 %504 }
 0x118   :  { %v462_v16 = vmax.f32 %v425_v5, 0.0  ;;  %v429_v17 = vadd.f32 %v428_v12, %v1116_v13  ;;  %v357_v18 = vpop.f32.mrf.mxu0  ;;  %v583_v24 = vadd.f32 %v582_v9, %v522_v3  ;;  %v525_v25 = vmul.f32 %v493_v48, %v461_v2 }
 0x119   :  { %v463_v22 = vmax.f32 %v356_v11, 0.0  ;;  %v358_v23 = vadd.f32 %v357_v18, %v1116_v13  ;;  %v430_v0 = vpop.f32.mrf.mxu1  ;;  %v524_v29 = vmul.f32 %v493_v48, %v460_v10  ;;  %v545_v40 = vadd.f32 %v544_v14, %v523_v21 }
 0x11a   :  { %v465_v26 = vmax.f32 %v429_v17, 0.0  ;;  %v431_v27 = vadd.f32 %v430_v0, %v1116_v13  ;;  %v359_v28 = vpop.f32.mrf.mxu0  ;;  %v526_v30 = vmul.f32 %v493_v48, %v462_v16  ;;  %v571_v44 = vadd.f32 %v570_v15, %v525_v25 }
 0x11b   :  { %v464_v31 = vmax.f32 %v358_v23, 0.0  ;;  %v360_v32 = vadd.f32 %v359_v28, %v1118_v36  ;;  %v432_v33 = vpop.f32.mrf.mxu1  ;;  %v527_v35 = vmul.f32 %v497_v19, %v463_v22  ;;  %v558_v50 = vadd.f32 %v557_v20, %v524_v29 }
 0x11c   :  { %v529_v37 = vmul.f32 %v497_v19, %v465_v26  ;;  %v466_v7 = vmax.f32 %v431_v27, 0.0  ;;  %v433_v38 = vadd.f32 %v432_v33, %v1118_v36  ;;  %v361_v39 = vpop.f32.mrf.mxu0  ;;  %v584_v51 = vadd.f32 %v583_v24, %v526_v30  ;;  %v509_v24 = vpop.permute.xlu0 %508 }
 0x11d   :  { %v528_v41 = vmul.f32 %v497_v19, %v464_v31  ;;  %v467_v42 = vmax.f32 %v360_v32, 0.0  ;;  %v362_v43 = vadd.f32 %v361_v39, %v1118_v36  ;;  %v434_v13 = vpop.f32.mrf.mxu1  ;;  %v546_v55 = vadd.f32 %v545_v40, %v527_v35 }
 0x11e   :  { %v530_v45 = vmul.f32 %v497_v19, %v466_v7  ;;  %v469_v46 = vmax.f32 %v433_v38, 0.0  ;;  %v435_v47 = vadd.f32 %v434_v13, %v1118_v36  ;;  %v365_v48 = vpop.f32.mrf.mxu0  ;;  %v572_v57 = vadd.f32 %v571_v44, %v529_v37 }
 0x11f   :  { %v468_v52 = vmax.f32 %v362_v43, 0.0  ;;  %v366_v53 = vadd.f32 %v365_v48, %v1123_v4  ;;  %v438_v54 = vpop.f32.mrf.mxu1  ;;  %v559_v56 = vadd.f32 %v558_v50, %v528_v41  ;;  %v531_v63 = vmul.f32 %v501_v49, %v467_v42 }
 0x120   :  { %v470_v58 = vmax.f32 %v435_v47, 0.0  ;;  %v439_v59 = vadd.f32 %v438_v54, %v1123_v4  ;;  %v367_v60 = vpop.f32.mrf.mxu0  ;;  %v585_v3 = vadd.f32 %v584_v51, %v530_v45  ;;  %v533_v2 = vmul.f32 %v501_v49, %v469_v46 }
 0x121   :  { %v471_v62 = vmax.f32 %v366_v53, 0.0  ;;  %v368_v36 = vadd.f32 %v367_v60, %v1123_v4  ;;  %v440_v1 = vpop.f32.mrf.mxu1  ;;  %v532_v9 = vmul.f32 %v501_v49, %v468_v52  ;;  %v547_v20 = vadd.f32 %v546_v55, %v531_v63 }
 0x122   :  { %v473_v5 = vmax.f32 %v439_v59, 0.0  ;;  %v441_v6 = vadd.f32 %v440_v1, %v1123_v4  ;;  %v369_v8 = vpop.f32.mrf.mxu0  ;;  %v534_v15 = vmul.f32 %v501_v49, %v470_v58  ;;  %v573_v25 = vadd.f32 %v572_v57, %v533_v2 }
 0x123   :  { %v472_v10 = vmax.f32 %v368_v36, 0.0  ;;  %v535_v11 = vmul.f32 %v505_v61, %v471_v62  ;;  %v370_v12 = vadd.f32 %v369_v8, %v170_v34  ;;  %v442_v14 = vpop.f32.mrf.mxu1  ;;  %v560_v28 = vadd.f32 %v559_v56, %v532_v9 }
 0x124   :  { %v474_v16 = vmax.f32 %v441_v6, 0.0  ;;  %v537_v17 = vmul.f32 %v505_v61, %v473_v5  ;;  %v443_v18 = vadd.f32 %v442_v14, %v170_v34  ;;  %v371_v19 = vpop.f32.mrf.mxu0  ;;  %v586_v32 = vadd.f32 %v585_v3, %v534_v15 }
 0x125   :  { %v536_v21 = vmul.f32 %v505_v61, %v472_v10  ;;  %v475_v22 = vmax.f32 %v370_v12, 0.0  ;;  %v372_v23 = vadd.f32 %v371_v19, %v170_v34  ;;  %v444_v0 = vpop.f32.mrf.mxu1  ;;  %v548_v29 = vadd.f32 %v547_v20, %v535_v11 }
 0x126   :  { %v538_v26 = vmul.f32 %v505_v61, %v474_v16  ;;  %v477_v4 = vmax.f32 %v443_v18, 0.0  ;;  %v445_v27 = vadd.f32 %v444_v0, %v170_v34  ;;  %v574_v33 = vadd.f32 %v573_v25, %v537_v17 }
 0x127   :  { %v539_v30 = vmul.f32 %v509_v24, %v475_v22  ;;  %v476_v31 = vmax.f32 %v372_v23, 0.0  ;;  %v561_v7 = vadd.f32 %v560_v28, %v536_v21  ;;  %v596_v60 = vstv %s1147_s3  ;;  %s800_s3 = smov [#allocation3]  }
 0x128   :  { %v541_v35 = vmul.f32 %v509_v24, %v477_v4  ;;  %v478_v37 = vmax.f32 %v445_v27, 0.0  ;;  %v587_v40 = vadd.f32 %v586_v32, %v538_v26  ;;  %v799_v26 = vmov 1966171168   ;;  %s661_s10 = sshll.u32 %s800_s3, 4  ;;  %s662_s10 = int_to_ptr.vmem [resolvable:$true] %s661_s10 }
 0x129   :  { %v549_v38 = vadd.f32 %v548_v29, %v539_v30  ;;  %v540_v39 = vmul.f32 %v509_v24, %v476_v31  ;;  %v628_v4 = vunpack.c.l.s4 %v799_v26  ;;  %v630_v27 = vlaneseq  ;;  %s775_s11 = scalar_lea.vmem %s662_s10, 64  ;;  %p780_p1 = scmp.lt.s32.totalorder %s662_s10, %s662_s10 }
 0x12a   :  { %v575_v41 = vadd.f32 %v574_v33, %v541_v35  ;;  %v542_v42 = vmul.f32 %v509_v24, %v478_v37  ;;  %p776_p0 = scmp.ne.s32.totalorder %s662_s10, %s775_s11  ;;  %p781_p2 = scmp.lt.s32.totalorder %s775_s11, %s775_s11 }
 0x12b   :  { %v550_v43 = vrot.slane %v549_v38, 4  ;;  %v562_v13 = vadd.f32 %v561_v7, %v540_v39  ;;  %v629_v28 = vunpack.c.0.s8 %v628_v4  ;;  %v631_v29 = vshrl.u32 %v630_v27, 7 }
 0x12c   :  { %v576_v44 = vrot.slane %v575_v41, 4  ;;  %v588_v45 = vadd.f32 %v587_v40, %v542_v42  ;;  %vm652_vm1 = vcmp.lt.s32.totalorder %v630_v27, 512  ;;  %p782_p3 = por %p781_p2, %p780_p1 }
 0x12d   :  { %v551_v46 = vadd.f32 %v550_v43, %v549_v38  ;;  %v563_v34 = vrot.slane %v562_v13, 4  ;;  %v632_v32 = vsub.s32 %v629_v28, %v631_v29 }
 0x12e   :  { %v577_v47 = vadd.f32 %v576_v44, %v575_v41  ;;  %v589_v48 = vrot.slane %v588_v45, 4  ;;  %p783_p4 = pnand %p782_p3, %p776_p0 }
 0x12f   :  { %v552_v49 = vrot.slane %v551_v46, 2  ;;  %v564_v50 = vadd.f32 %v563_v34, %v562_v13 }
 0x130   :  { %v578_v51 = vrot.slane %v577_v47, 2  ;;  %v590_v52 = vadd.f32 %v589_v48, %v588_v45 }
 0x131   :  { %v553_v53 = vadd.f32 %v552_v49, %v551_v46  ;;  %v565_v54 = vrot.slane %v564_v50, 2 }
 0x132   :  { %v579_v55 = vadd.f32 %v578_v51, %v577_v47  ;;  %v591_v57 = vrot.slane %v590_v52, 2 }
 0x133   :  { %v554_v58 = vrot.slane %v553_v53, 1  ;;  %v566_v59 = vadd.f32 %v565_v54, %v564_v50 }
 0x134   :  { %v580_v61 = vrot.slane %v579_v55, 1  ;;  %v592_v56 = vadd.f32 %v591_v57, %v590_v52 }
 0x135   :  { %v555_v63 = vadd.f32 %v554_v58, %v553_v53  ;;  %v567_v62 = vrot.slane %v566_v59, 1 }
 0x136   :  { %v581_v36 = vadd.f32 %v580_v61, %v579_v55  ;;  %v593_v1 = vrot.slane %v592_v56, 1 }
 0x137   :  { %v597_v3 = vadd.f32 %v596_v60, %v555_v63  ;;  %v568_v2 = vadd.f32 %v567_v62, %v566_v59 }
 0x138   :  { %v599_v5 = vadd.f32 %v596_v60, %v581_v36  ;;  %v594_v6 = vadd.f32 %v593_v1, %v592_v56 }
 0x139   :  { %v601_v8 = vsub.f32 0.0, %v597_v3  ;;  %v598_v9 = vadd.f32 %v596_v60, %v568_v2 }
 0x13a   :  { %v603_v10 = vsub.f32 0.0, %v599_v5  ;;  %v600_v11 = vadd.f32 %v596_v60, %v594_v6 }
 0x13b   :  { %v605_v12 = vmul.f32 1.442695, %v601_v8  ;;  %v602_v14 = vsub.f32 0.0, %v598_v9 }
 0x13c   :  { %v609_v15 = vmul.f32 1.442695, %v603_v10  ;;  %v604_v16 = vsub.f32 0.0, %v600_v11 }
 0x13d   :  { %759 = vpow2.f32 %v605_v12  ;;  %v607_v17 = vmul.f32 1.442695, %v602_v14 }
 0x13e   :  { %761 = vpow2.f32 %v609_v15  ;;  %v611_v18 = vmul.f32 1.442695, %v604_v16 }
 0x13f   :  { %763 = vpow2.f32 %v607_v17 }
 0x140   :  { %765 = vpow2.f32 %v611_v18 }
 0x14a   :  { %v760_v19 = vpop.eup %759 }
 0x14b   :  { %v762_v20 = vpop.eup %761  ;;  %v613_v21 = vadd.f32 1.0, %v760_v19 }
 0x14c   :  { %v764_v22 = vpop.eup %763  ;;  %v615_v23 = vadd.f32 1.0, %v762_v20 }
 0x14d   :  { %v766_v0 = vpop.eup %765  ;;  %767 = vrcp.f32 %v613_v21  ;;  %v614_v24 = vadd.f32 1.0, %v764_v22 }
 0x14e   :  { %769 = vrcp.f32 %v615_v23  ;;  %v616_v25 = vadd.f32 1.0, %v766_v0 }
 0x14f   :  { %771 = vrcp.f32 %v614_v24 }
 0x150   :  { %773 = vrcp.f32 %v616_v25 }
 0x15a   :  { %v768_v30 = vpop.eup %767 }
 0x15b   :  { %v770_v31 = vpop.eup %769 }
 0x15c   :  { %v772_v33 = vpop.eup %771 }
 0x15d   :  { %v774_v35 = vpop.eup %773  ;;  %v625_v37 = vcombine.low %v768_v30, %v772_v33 }
 0x15e   :  { %v626_v7 = vcombine.low %v770_v31, %v774_v35 }
 0x15f   :  { %v633_v38 = vrot.slane %v625_v37, %v632_v32 }
 0x160   :  { %v640_v39 = vrot.slane %v626_v7, %v632_v32 }
 0x162   :  { %v641_v40 = vcombine.low %v633_v38, %v640_v39 }
 0x164   :  { %v648_v41 = vrot.slane %v641_v40, %v632_v32 }
 0x166   :  { %654 = vst.msk [vmem:[#allocation3] sm:$0xf] %vm652_vm1, %v648_v41 }
 0x167   :  { %786 = shalt.err (!%p783_p4)
}
 0x168   :  { %664 = dma.vmem_to_hbm [thread:$0]  %s662_s10, 64, %s1148_s4, [#allocation4]  }
 0x169   :  { %795 = dma.done.wait [#allocation4], 64  }
 0x16a   :  { %796 = vsyncadd [#allocation4], 4294967232 }
 0x16b   :  { %668 = vsyncpa [#allocation4], 1 }

</bundles_post_ra>
